<compile_context>
chip_gen: v7x
topology: tpu7x:2x2x1
jax: 0.10.0
libtpu: 0.0.40
codegen_flags: <defaults>
</compile_context>

<pallas_src>
import functools
import math

import jax
import jax.numpy as jnp
from jax import lax
from jax.experimental import pallas as pl
from jax.experimental.pallas import tpu as pltpu


def _round_up(n: int, m: int) -> int:
    return ((n + m - 1) // m) * m


def _pick_tile(n: int, target: int) -> int:
    """Largest divisor of n that is <= target, preferring multiples of 8."""
    best, best8 = 1, 0
    for t in range(1, min(target, n) + 1):
        if n % t == 0:
            best = t
            if t % 8 == 0:
                best8 = t
    return best8 if best8 else best


# --------------------------------------------------------------------------
# 1) fused q/k/v projection kernel:  y = x @ W^T  (nn.Linear weight is (out,in))
# --------------------------------------------------------------------------

def _qkv_proj_kernel(x_ref, wq_ref, wk_ref, wv_ref, q_ref, k_ref, v_ref):
    x = x_ref[...]                                   # (Tm, H)
    dn = (((1,), (1,)), ((), ()))                    # contract last dims (== x @ W^T)
    q = lax.dot_general(x, wq_ref[...], dn, preferred_element_type=jnp.float32)
    k = lax.dot_general(x, wk_ref[...], dn, preferred_element_type=jnp.float32)
    v = lax.dot_general(x, wv_ref[...], dn, preferred_element_type=jnp.float32)
    q_ref[...] = q.astype(q_ref.dtype)
    k_ref[...] = k.astype(k_ref.dtype)
    v_ref[...] = v.astype(v_ref.dtype)


def _project_qkv(x2d, wq, wk, wv, *, tile_m):
    M, H = x2d.shape
    itemsize = jnp.dtype(x2d.dtype).itemsize
    out = jax.ShapeDtypeStruct((M, H), x2d.dtype)
    cost = pl.CostEstimate(
        flops=int(3 * 2 * M * H * H),
        transcendentals=0,
        bytes_accessed=int((4 * M * H + 3 * H * H) * itemsize))
    return pl.pallas_call(
        _qkv_proj_kernel,
        out_shape=(out, out, out),
        grid_spec=pltpu.PrefetchScalarGridSpec(
            num_scalar_prefetch=0,
            grid=(M // tile_m,),
            in_specs=[
                pl.BlockSpec((tile_m, H), lambda i: (i, 0)),   # x rows
                pl.BlockSpec((H, H), lambda i: (0, 0)),        # Wq (resident)
                pl.BlockSpec((H, H), lambda i: (0, 0)),        # Wk
                pl.BlockSpec((H, H), lambda i: (0, 0)),        # Wv
            ],
            out_specs=[
                pl.BlockSpec((tile_m, H), lambda i: (i, 0)),
                pl.BlockSpec((tile_m, H), lambda i: (i, 0)),
                pl.BlockSpec((tile_m, H), lambda i: (i, 0)),
            ],
        ),
        compiler_params=pltpu.CompilerParams(
            dimension_semantics=("parallel",),
            vmem_limit_bytes=32 * 1024 * 1024),
        cost_estimate=cost,
    )(x2d, wq, wk, wv)


# --------------------------------------------------------------------------
# 2) tiled retention attention kernel with causal tile skipping
# --------------------------------------------------------------------------

def _retention_attn_kernel(q_ref, k_ref, v_ref, o_ref, acc_ref, *, log_gamma):
    qi = pl.program_id(1)
    ki = pl.program_id(2)
    tq = q_ref.shape[1]
    tk = k_ref.shape[1]

    @pl.when(ki == 0)
    def _():
        acc_ref[...] = jnp.zeros_like(acc_ref)

    # A kv tile contributes only if it intersects the lower triangle (i >= j).
    @pl.when(ki * tk < (qi + 1) * tq)
    def _():
        q = q_ref[0]                                 # (tq, H)
        k = k_ref[0]                                 # (tk, H)
        dn = (((1,), (1,)), ((), ()))                # q @ k^T without transpose
        s = lax.dot_general(q, k, dn, preferred_element_type=jnp.float32)  # (tq, tk)

        # Decay tile: D[i, j] = gamma**(i-j) for i >= j else 0,
        # generated as exp(diff * log(gamma)) with diff clamped >= 0.
        row = lax.broadcasted_iota(jnp.int32, (tq, tk), 0) + qi * tq
        col = lax.broadcasted_iota(jnp.int32, (tq, tk), 1) + ki * tk
        diff = row - col
        decay = jnp.where(
            diff >= 0,
            jnp.exp(jnp.maximum(diff, 0).astype(jnp.float32)
                    * jnp.float32(log_gamma)),
            jnp.float32(0.0))

        att = (s * decay).astype(v_ref.dtype)
        acc_ref[...] += jnp.dot(att, v_ref[0],
                                preferred_element_type=jnp.float32)

    @pl.when(ki == pl.num_programs(2) - 1)
    def _():
        o_ref[0] = acc_ref[...].astype(o_ref.dtype)


# --------------------------------------------------------------------------
# wrapper
# --------------------------------------------------------------------------

def retention_forward(x, wq, wk, wv, gamma: float,
                      compute_dtype=jnp.bfloat16,
                      block_q: int = 256, block_k: int = 256,
                      block_m: int = 256):
    """Parallel retention forward.  x: (B, S, H); weights: (H, H) in (out, in)."""
    assert gamma > 0.0, "gamma must be positive"
    B, S, H = x.shape
    out_dtype = x.dtype

    # Lane-dense layout: pad hidden to a multiple of 128 (>=128) and the
    # sequence to a multiple of 8.  Zero padding is exact for this op.
    Hp = max(128, _round_up(H, 128))
    Sp = _round_up(S, 8)

    xc = x.astype(compute_dtype)
    if Hp != H or Sp != S:
        xc = jnp.pad(xc, ((0, 0), (0, Sp - S), (0, Hp - H)))

    def _pad_w(w):
        w = w.astype(compute_dtype)
        if Hp != H:
            w = jnp.pad(w, ((0, Hp - H), (0, Hp - H)))
        return w

    wqc, wkc, wvc = _pad_w(wq), _pad_w(wk), _pad_w(wv)

    # ---- projections (done once; not recomputed per q tile) ----
    M = B * Sp
    tile_m = _pick_tile(M, block_m)
    q2, k2, v2 = _project_qkv(xc.reshape(M, Hp), wqc, wkc, wvc, tile_m=tile_m)
    q = q2.reshape(B, Sp, Hp)
    k = k2.reshape(B, Sp, Hp)
    v = v2.reshape(B, Sp, Hp)

    # ---- attention ----
    tq = _pick_tile(Sp, block_q)
    tk = _pick_tile(Sp, block_k)
    grid = (B, Sp // tq, Sp // tk)

    itemsize = jnp.dtype(compute_dtype).itemsize
    cost = pl.CostEstimate(
        flops=int(2 * B * Sp * Sp * Hp),             # two matmuls, ~causal half
        transcendentals=int(B * Sp * Sp // 2),       # decay exp per lower-tri elem
        bytes_accessed=int(4 * B * Sp * Hp * itemsize))

    kernel = functools.partial(_retention_attn_kernel,
                               log_gamma=float(math.log(gamma)))

    out = pl.pallas_call(
        kernel,
        out_shape=jax.ShapeDtypeStruct((B, Sp, Hp), out_dtype),
        grid_spec=pltpu.PrefetchScalarGridSpec(
            num_scalar_prefetch=0,
            grid=grid,
            in_specs=[
                pl.BlockSpec((1, tq, Hp), lambda b, i, j: (b, i, 0)),  # q tile
                pl.BlockSpec((1, tk, Hp), lambda b, i, j: (b, j, 0)),  # k tile
                pl.BlockSpec((1, tk, Hp), lambda b, i, j: (b, j, 0)),  # v tile
            ],
            out_specs=pl.BlockSpec((1, tq, Hp), lambda b, i, j: (b, i, 0)),
            scratch_shapes=[pltpu.VMEM((tq, Hp), jnp.float32)],
        ),
        compiler_params=pltpu.CompilerParams(
            dimension_semantics=("parallel", "parallel", "arbitrary"),
            vmem_limit_bytes=32 * 1024 * 1024),
        cost_estimate=cost,
    )(q, k, v)

    if Hp != H or Sp != S:
        out = out[:, :S, :H]
    return out


def retention_reference(x, wq, wk, wv, gamma: float):
    """Plain-JAX f32 reference mirroring the PyTorch forward()."""
    B, S, H = x.shape
    q = jnp.einsum("bsh,oh->bso", x, wq)
    k = jnp.einsum("bsh,oh->bso", x, wk)
    v = jnp.einsum("bsh,oh->bso", x, wv)
    row = jnp.arange(S)[:, None]
    col = jnp.arange(S)[None, :]
    decay = jnp.where(row >= col, gamma ** (row - col).astype(jnp.float32), 0.0)
    att = jnp.einsum("bqh,bkh->bqk", q, k) * decay[None]
    return jnp.einsum("bqk,bkh->bqh", att, v)


if __name__ == "__main__":
    # Small deterministic config (hidden_size == head_size, as in the module).
    batch_size = 2
    seq_len = 8
    hidden_size = 32       # == head_size
    gamma = 0.9
    # chunk_size is unused by the parallel forward() path.

    key = jax.random.PRNGKey(0)
    kx, kq, kk, kv = jax.random.split(key, 4)
    x = jax.random.normal(kx, (batch_size, seq_len, hidden_size), dtype=jnp.float32)
    # nn.Linear(hidden, hidden, bias=False) weights, shape (out, in).
    scale = 1.0 / math.sqrt(hidden_size)
    wq = jax.random.uniform(kq, (hidden_size, hidden_size), jnp.float32, -scale, scale)
    wk = jax.random.uniform(kk, (hidden_size, hidden_size), jnp.float32, -scale, scale)
    wv = jax.random.uniform(kv, (hidden_size, hidden_size), jnp.float32, -scale, scale)

    ref = retention_reference(x, wq, wk, wv, gamma)

    # f32 compute path: tight numerical check.
    out_f32 = jax.block_until_ready(
        retention_forward(x, wq, wk, wv, gamma, compute_dtype=jnp.float32))
    assert out_f32.shape == (batch_size, seq_len, hidden_size)
    assert jnp.allclose(out_f32, ref, atol=1e-4, rtol=1e-4), "f32 mismatch vs reference"

    # bf16 MXU path (default): bf16-appropriate tolerance.
    out_bf16 = jax.block_until_ready(retention_forward(x, wq, wk, wv, gamma))
    assert out_bf16.shape == (batch_size, seq_len, hidden_size)
    assert jnp.allclose(out_bf16, ref, atol=1e-1, rtol=5e-2), "bf16 mismatch vs reference"

    print("KERNEL_OK")
</pallas_src>

<mosaic_0001>
module attributes {stable_mosaic.version = 11 : i64} {
  func.func @_qkv_proj_kernel(%arg0: i32, %arg1: memref<16x128xf32, #tpu.memory_space<vmem>>, %arg2: memref<128x128xf32, #tpu.memory_space<vmem>>, %arg3: memref<128x128xf32, #tpu.memory_space<vmem>>, %arg4: memref<128x128xf32, #tpu.memory_space<vmem>>, %arg5: memref<16x128xf32, #tpu.memory_space<vmem>>, %arg6: memref<16x128xf32, #tpu.memory_space<vmem>>, %arg7: memref<16x128xf32, #tpu.memory_space<vmem>>) attributes {dimension_semantics = [#tpu.dimension_semantics<parallel>], iteration_bounds = array<i64: 1>, scalar_prefetch = 0 : i64, scratch_operands = 0 : i64, tpu.core_type = #tpu.core_type<tc>, window_params = [{transform_indices = @transform_0, window_bounds = array<i64: 16, 128>}, {pipeline_mode = #tpu.pipeline_mode<synchronous>, transform_indices = @transform_1, window_bounds = array<i64: 128, 128>}, {pipeline_mode = #tpu.pipeline_mode<synchronous>, transform_indices = @transform_2, window_bounds = array<i64: 128, 128>}, {pipeline_mode = #tpu.pipeline_mode<synchronous>, transform_indices = @transform_3, window_bounds = array<i64: 128, 128>}, {transform_indices = @transform_4, window_bounds = array<i64: 16, 128>}, {transform_indices = @transform_5, window_bounds = array<i64: 16, 128>}, {transform_indices = @transform_6, window_bounds = array<i64: 16, 128>}]} {
    %c0 = arith.constant 0 : index
    %c0_0 = arith.constant 0 : index
    %0 = vector.load %arg1[%c0, %c0_0] : memref<16x128xf32, #tpu.memory_space<vmem>>, vector<16x128xf32>
    %c0_1 = arith.constant 0 : index
    %c0_2 = arith.constant 0 : index
    %1 = vector.load %arg2[%c0_1, %c0_2] : memref<128x128xf32, #tpu.memory_space<vmem>>, vector<128x128xf32>
    %cst = arith.constant dense<0.000000e+00> : vector<16x128xf32>
    %2 = tpu.matmul %0, %1, %cst {dimension_numbers = #tpu.dot_dimension_numbers<[1], [1], [0], [0], [0, 0, 1, 0], [], []>} : vector<16x128xf32>, vector<128x128xf32>, vector<16x128xf32> -> vector<16x128xf32>
    %c0_3 = arith.constant 0 : index
    %c0_4 = arith.constant 0 : index
    %3 = vector.load %arg3[%c0_3, %c0_4] : memref<128x128xf32, #tpu.memory_space<vmem>>, vector<128x128xf32>
    %cst_5 = arith.constant dense<0.000000e+00> : vector<16x128xf32>
    %4 = tpu.matmul %0, %3, %cst_5 {dimension_numbers = #tpu.dot_dimension_numbers<[1], [1], [0], [0], [0, 0, 1, 0], [], []>} : vector<16x128xf32>, vector<128x128xf32>, vector<16x128xf32> -> vector<16x128xf32>
    %c0_6 = arith.constant 0 : index
    %c0_7 = arith.constant 0 : index
    %5 = vector.load %arg4[%c0_6, %c0_7] : memref<128x128xf32, #tpu.memory_space<vmem>>, vector<128x128xf32>
    %cst_8 = arith.constant dense<0.000000e+00> : vector<16x128xf32>
    %6 = tpu.matmul %0, %5, %cst_8 {dimension_numbers = #tpu.dot_dimension_numbers<[1], [1], [0], [0], [0, 0, 1, 0], [], []>} : vector<16x128xf32>, vector<128x128xf32>, vector<16x128xf32> -> vector<16x128xf32>
    %c0_9 = arith.constant 0 : index
    %c0_10 = arith.constant 0 : index
    %7 = vector.load %arg5[%c0_9, %c0_10] : memref<16x128xf32, #tpu.memory_space<vmem>>, vector<16x128xf32>
    tpu.vector_store %arg5[%c0_9, %c0_10], %2 {strides = array<i32>} : memref<16x128xf32, #tpu.memory_space<vmem>>, vector<16x128xf32>,
    %c0_11 = arith.constant 0 : index
    %c0_12 = arith.constant 0 : index
    %8 = vector.load %arg6[%c0_11, %c0_12] : memref<16x128xf32, #tpu.memory_space<vmem>>, vector<16x128xf32>
    tpu.vector_store %arg6[%c0_11, %c0_12], %4 {strides = array<i32>} : memref<16x128xf32, #tpu.memory_space<vmem>>, vector<16x128xf32>,
    %c0_13 = arith.constant 0 : index
    %c0_14 = arith.constant 0 : index
    %9 = vector.load %arg7[%c0_13, %c0_14] : memref<16x128xf32, #tpu.memory_space<vmem>>, vector<16x128xf32>
    tpu.vector_store %arg7[%c0_13, %c0_14], %6 {strides = array<i32>} : memref<16x128xf32, #tpu.memory_space<vmem>>, vector<16x128xf32>,
    return
  }
  func.func @transform_0(%arg0: i32) -> (i32, i32) {
    %c0_i32 = arith.constant 0 : i32
    %c0_i32_0 = arith.constant 0 : i32
    return %arg0, %c0_i32 : i32, i32
  }
  func.func @transform_1(%arg0: i32) -> (i32, i32) {
    %c0_i32 = arith.constant 0 : i32
    %c0_i32_0 = arith.constant 0 : i32
    %c0_i32_1 = arith.constant 0 : i32
    return %c0_i32, %c0_i32_0 : i32, i32
  }
  func.func @transform_2(%arg0: i32) -> (i32, i32) {
    %c0_i32 = arith.constant 0 : i32
    %c0_i32_0 = arith.constant 0 : i32
    %c0_i32_1 = arith.constant 0 : i32
    return %c0_i32, %c0_i32_0 : i32, i32
  }
  func.func @transform_3(%arg0: i32) -> (i32, i32) {
    %c0_i32 = arith.constant 0 : i32
    %c0_i32_0 = arith.constant 0 : i32
    %c0_i32_1 = arith.constant 0 : i32
    return %c0_i32, %c0_i32_0 : i32, i32
  }
  func.func @transform_4(%arg0: i32) -> (i32, i32) {
    %c0_i32 = arith.constant 0 : i32
    %c0_i32_0 = arith.constant 0 : i32
    return %arg0, %c0_i32 : i32, i32
  }
  func.func @transform_5(%arg0: i32) -> (i32, i32) {
    %c0_i32 = arith.constant 0 : i32
    %c0_i32_0 = arith.constant 0 : i32
    return %arg0, %c0_i32 : i32, i32
  }
  func.func @transform_6(%arg0: i32) -> (i32, i32) {
    %c0_i32 = arith.constant 0 : i32
    %c0_i32_0 = arith.constant 0 : i32
    return %arg0, %c0_i32 : i32, i32
  }
}

</mosaic_0001>

<bundles_post_ra>
// kernel: tpu_custom_call.1
= control target key start
LH: loop header
LB: loop body
LE: loop exit
PB: predicated region body
PF: predicated region fallthrough
CT: control target
= control target key end

     0   :  { %12 = vsyncpa [#allocation3], 0  ;;  %s1004_s0 = inlined_call_operand.hbm [shape: f32[16,128], index: 0, kind: input, shape index: {}]   ;;  %s1005_s1 = inlined_call_operand.hbm [shape: f32[128,128], index: 1, kind: input, shape index: {}]   ;;  %s1006_s2 = inlined_call_operand.hbm [shape: f32[128,128], index: 2, kind: input, shape index: {}]   ;;  %s1007_s3 = inlined_call_operand.hbm [shape: f32[128,128], index: 3, kind: input, shape index: {}]   ;;  %s1008_s4 = inlined_call_operand.hbm [shape: f32[16,128], index: 4, kind: output, shape index: {0}]   ;;  %s1009_s5 = inlined_call_operand.hbm [shape: f32[16,128], index: 5, kind: output, shape index: {1}]   ;;  %s1010_s6 = inlined_call_operand.hbm [shape: f32[16,128], index: 6, kind: output, shape index: {2}]  }
   0x1   :  { %13 = vsyncpa [#allocation6], 0 }
   0x2   :  { %14 = vsyncpa [#allocation9], 0 }
   0x3   :  { %15 = vsyncpa [#allocation4], 0 }
   0x4   :  { %16 = vsyncpa [#allocation12], 0  ;;  %s836_s21 = smov [#allocation5]   ;;  %s837_s23 = smov [#allocation2]  }
   0x5   :  { %s34_s22 = sshll.u32 %s836_s21, 4  ;;  %s22_s24 = sshll.u32 %s837_s23, 4  ;;  %s35_s22 = int_to_ptr.vmem [resolvable:$true] %s34_s22  ;;  %s880_s24 = int_to_ptr.vmem [resolvable:$true] %s22_s24 }
   0x6   :  { %s672_s27 = scalar_lea.hbm %s1005_s1, 2048 }
   0x7   :  { %p673_p0 = scmp.ne.s32.totalorder %s1005_s1, %s672_s27  ;;  %p676_p1 = scmp.lt.u32.totalorder %s672_s27, %s1005_s1 }
   0x9   :  { %p678_p2 = pnand %p676_p1, %p673_p0 }
   0xb   :  { %681 = shalt.err (!%p678_p2)
}
   0xc   :  { %s682_s8 = scalar_lea.vmem %s35_s22, 2048  ;;  %p687_p4 = scmp.lt.s32.totalorder %s35_s22, %s35_s22 }
   0xd   :  { %p683_p3 = scmp.ne.s32.totalorder %s35_s22, %s682_s8  ;;  %p688_p5 = scmp.lt.s32.totalorder %s682_s8, %s682_s8 }
   0xf   :  { %p689_p6 = por %p688_p5, %p687_p4 }
  0x11   :  { %p690_p7 = pnand %p689_p6, %p683_p3 }
  0x13   :  { %693 = shalt.err (!%p690_p7)
}
  0x14   :  { %s838_s9 = smov 128   ;;  %s839_s10 = smov 8  }
  0x15   :  { %40 = dma.hbm_to_vmem [thread:$0]  %s1005_s1, 2048, %s35_s22, [#allocation6], %s838_s9, %s838_s9, %s839_s10  }
  0x16   :  { %s694_s15 = scalar_lea.hbm %s1004_s0, 256 }
  0x17   :  { %p695_p8 = scmp.ne.s32.totalorder %s1004_s0, %s694_s15  ;;  %p698_p9 = scmp.lt.u32.totalorder %s694_s15, %s1004_s0 }
  0x19   :  { %p700_p10 = pnand %p698_p9, %p695_p8 }
  0x1b   :  { %703 = shalt.err (!%p700_p10)
}
  0x1c   :  { %s704_s20 = scalar_lea.vmem %s880_s24, 256  ;;  %p709_p12 = scmp.lt.s32.totalorder %s880_s24, %s880_s24 }
  0x1d   :  { %p705_p11 = scmp.ne.s32.totalorder %s880_s24, %s704_s20  ;;  %p710_p13 = scmp.lt.s32.totalorder %s704_s20, %s704_s20 }
  0x1f   :  { %p711_p0 = por %p710_p13, %p709_p12 }
  0x21   :  { %p712_p1 = pnand %p711_p0, %p705_p11 }
  0x23   :  { %715 = shalt.err (!%p712_p1)
}
  0x24   :  { %28 = dma.hbm_to_vmem [thread:$0]  %s1004_s0, 256, %s880_s24, [#allocation3], %s838_s9, %s838_s9, %s839_s10  }
  0x25   :  { %s840_s22 = smov [#allocation7]   ;;  %s841_s25 = smov [#allocation8]  }
  0x26   :  { %s46_s23 = sshll.u32 %s840_s22, 4  ;;  %s58_s26 = sshll.u32 %s841_s25, 4  ;;  %s47_s23 = int_to_ptr.vmem [resolvable:$true] %s46_s23  ;;  %s917_s26 = int_to_ptr.vmem [resolvable:$true] %s58_s26 }
  0x27   :  { %s716_s29 = scalar_lea.hbm %s1006_s2, 2048 }
  0x28   :  { %p717_p2 = scmp.ne.s32.totalorder %s1006_s2, %s716_s29  ;;  %p720_p3 = scmp.lt.u32.totalorder %s716_s29, %s1006_s2 }
  0x2a   :  { %p722_p4 = pnand %p720_p3, %p717_p2 }
  0x2c   :  { %725 = shalt.err (!%p722_p4)
}
  0x2d   :  { %s726_s0 = scalar_lea.vmem %s47_s23, 2048  ;;  %p731_p6 = scmp.lt.s32.totalorder %s47_s23, %s47_s23 }
  0x2e   :  { %p727_p5 = scmp.ne.s32.totalorder %s47_s23, %s726_s0  ;;  %p732_p7 = scmp.lt.s32.totalorder %s726_s0, %s726_s0 }
  0x30   :  { %p733_p8 = por %p732_p7, %p731_p6 }
  0x32   :  { %p734_p9 = pnand %p733_p8, %p727_p5 }
  0x34   :  { %737 = shalt.err (!%p734_p9)
}
  0x35   :  { %52 = dma.hbm_to_vmem [thread:$0]  %s1006_s2, 2048, %s47_s23, [#allocation6], %s838_s9, %s838_s9, %s839_s10  }
  0x36   :  { %s738_s15 = scalar_lea.hbm %s1007_s3, 2048 }
  0x37   :  { %p739_p10 = scmp.ne.s32.totalorder %s1007_s3, %s738_s15  ;;  %p742_p11 = scmp.lt.u32.totalorder %s738_s15, %s1007_s3 }
  0x39   :  { %p744_p12 = pnand %p742_p11, %p739_p10 }
  0x3b   :  { %747 = shalt.err (!%p744_p12)
}
  0x3c   :  { %s748_s20 = scalar_lea.vmem %s917_s26, 2048  ;;  %p753_p0 = scmp.lt.s32.totalorder %s917_s26, %s917_s26 }
  0x3d   :  { %p749_p13 = scmp.ne.s32.totalorder %s917_s26, %s748_s20  ;;  %p754_p1 = scmp.lt.s32.totalorder %s748_s20, %s748_s20 }
  0x3f   :  { %p755_p2 = por %p754_p1, %p753_p0 }
  0x41   :  { %p756_p3 = pnand %p755_p2, %p749_p13 }
  0x43   :  { %759 = shalt.err (!%p756_p3)
}
  0x44   :  { %64 = dma.hbm_to_vmem [thread:$0]  %s1007_s3, 2048, %s917_s26, [#allocation9], %s838_s9, %s838_s9, %s839_s10  }
  0x45   :  { %826 = dma.done.wait [#allocation3], 256  }
  0x46   :  { %827 = vsyncadd [#allocation3], 4294967040 }
  0x47   :  { %828 = dma.done.wait [#allocation6], 4096  }
  0x48   :  { %829 = vsyncadd [#allocation6], 4294963200 }
  0x49   :  { %830 = dma.done.wait [#allocation9], 2048  }
  0x4a   :  { %831 = vsyncadd [#allocation9], 4294965248  ;;  %v79_v0 = vld [vmem:[#allocation5] sm:$0xff]  ;;  %v80_v1 = vld [vmem:[#allocation5 + $0x8] sm:$0xff]  ;;  %s842_s3 = smov [#allocation10]   ;;  %s843_s22 = smov [#allocation11]  }
  0x4b   :  { %v81_v2 = vld [vmem:[#allocation5 + $0x10] sm:$0xff]  ;;  %v567_v3 = vpack.c.bf16 %v80_v1, %v79_v0  ;;  %v82_v4 = vld [vmem:[#allocation5 + $0x18] sm:$0xff]  ;;  %v170_v6 = vld [vmem:[#allocation7] sm:$0xff]  ;;  %s363_s21 = sshll.u32 %s842_s3, 4  ;;  %s375_s23 = sshll.u32 %s843_s22, 4  ;;  %s364_s21 = int_to_ptr.vmem [resolvable:$true] %s363_s21  ;;  %s376_s23 = int_to_ptr.vmem [resolvable:$true] %s375_s23 }
  0x4c   :  { %v571_v5 = vpack.c.bf16 %v82_v4, %v81_v2  ;;  %v171_v7 = vld [vmem:[#allocation7 + $0x8] sm:$0xff]  ;;  %v83_v8 = vld [vmem:[#allocation5 + $0x20] sm:$0xff]  ;;  %v954_v11 = vld [vmem:[#allocation2] sm:$0xff]  ;;  %s760_s25 = scalar_lea.vmem %s364_s21, 256  ;;  %p765_p5 = scmp.lt.s32.totalorder %s364_s21, %s364_s21 }
  0x4d   :  { %568 = vmatprep.subr.bf16.mxu0 %v567_v3  ;;  %v84_v9 = vld [vmem:[#allocation5 + $0x28] sm:$0xff]  ;;  %v599_v10 = vpack.c.bf16 %v171_v7, %v170_v6  ;;  %494 = vmatprep.mubr.f32.mxu0 %v954_v11  ;;  %v172_v12 = vld [vmem:[#allocation7 + $0x10] sm:$0xff]  ;;  %v173_v13 = vld [vmem:[#allocation7 + $0x18] sm:$0xff]  ;;  %p761_p4 = scmp.ne.s32.totalorder %s364_s21, %s760_s25  ;;  %p766_p6 = scmp.lt.s32.totalorder %s760_s25, %s760_s25 }
  0x4e   :  { %570 = vmatpush3.bf16.xpose.msra.mxu0 %v567_v3  ;;  %529 = vmatprep.mubr.f32.mxu1 %v954_v11  ;;  %v603_v14 = vpack.c.bf16 %v173_v13, %v172_v12  ;;  %v575_v15 = vpack.c.bf16 %v84_v9, %v83_v8  ;;  %v174_v16 = vld [vmem:[#allocation7 + $0x20] sm:$0xff]  ;;  %v175_v17 = vld [vmem:[#allocation7 + $0x28] sm:$0xff]  ;;  %v85_v18 = vld [vmem:[#allocation5 + $0x30] sm:$0xff] }
  0x4f   :  { %572 = vmatprep.subr.bf16.mxu0 %v571_v5  ;;  %600 = vmatprep.subr.bf16.mxu1 %v599_v10  ;;  %v86_v19 = vld [vmem:[#allocation5 + $0x38] sm:$0xff]  ;;  %v607_v20 = vpack.c.bf16 %v175_v17, %v174_v16  ;;  %v176_v22 = vld [vmem:[#allocation7 + $0x30] sm:$0xff]  ;;  %v87_v24 = vld [vmem:[#allocation5 + $0x40] sm:$0xff]  ;;  %p767_p7 = por %p766_p6, %p765_p5 }
  0x50   :  { %602 = vmatpush3.bf16.xpose.msra.mxu1 %v599_v10  ;;  %v579_v21 = vpack.c.bf16 %v86_v19, %v85_v18  ;;  %v177_v23 = vld [vmem:[#allocation7 + $0x38] sm:$0xff]  ;;  %v88_v25 = vld [vmem:[#allocation5 + $0x48] sm:$0xff]  ;;  %v178_v28 = vld [vmem:[#allocation7 + $0x40] sm:$0xff] }
  0x51   :  { %604 = vmatprep.subr.bf16.mxu1 %v603_v14  ;;  %v611_v26 = vpack.c.bf16 %v177_v23, %v176_v22  ;;  %v583_v27 = vpack.c.bf16 %v88_v25, %v87_v24  ;;  %v179_v29 = vld [vmem:[#allocation7 + $0x48] sm:$0xff]  ;;  %v89_v30 = vld [vmem:[#allocation5 + $0x50] sm:$0xff]  ;;  %v90_v31 = vld [vmem:[#allocation5 + $0x58] sm:$0xff]  ;;  %p768_p8 = pnand %p767_p7, %p761_p4 }
  0x52   :  { %v615_v32 = vpack.c.bf16 %v179_v29, %v178_v28  ;;  %v587_v33 = vpack.c.bf16 %v90_v31, %v89_v30  ;;  %v180_v34 = vld [vmem:[#allocation7 + $0x50] sm:$0xff]  ;;  %v181_v35 = vld [vmem:[#allocation7 + $0x58] sm:$0xff]  ;;  %v91_v36 = vld [vmem:[#allocation5 + $0x60] sm:$0xff] }
  0x53   :  { %v92_v37 = vld [vmem:[#allocation5 + $0x68] sm:$0xff]  ;;  %v619_v38 = vpack.c.bf16 %v181_v35, %v180_v34  ;;  %v182_v40 = vld [vmem:[#allocation7 + $0x60] sm:$0xff]  ;;  %v93_v42 = vld [vmem:[#allocation5 + $0x70] sm:$0xff] }
  0x54   :  { %v591_v39 = vpack.c.bf16 %v92_v37, %v91_v36  ;;  %v183_v41 = vld [vmem:[#allocation7 + $0x68] sm:$0xff]  ;;  %v94_v43 = vld [vmem:[#allocation5 + $0x78] sm:$0xff]  ;;  %v184_v46 = vld [vmem:[#allocation7 + $0x70] sm:$0xff] }
  0x55   :  { %v623_v44 = vpack.c.bf16 %v183_v41, %v182_v40  ;;  %v595_v45 = vpack.c.bf16 %v94_v43, %v93_v42  ;;  %v185_v47 = vld [vmem:[#allocation7 + $0x78] sm:$0xff]  ;;  %v261_v48 = vld [vmem:[#allocation8] sm:$0xff]  ;;  %v262_v49 = vld [vmem:[#allocation8 + $0x8] sm:$0xff] }
  0x56   :  { %574 = vmatpush3.bf16.xpose.msra.mxu0 %v571_v5  ;;  %v627_v50 = vpack.c.bf16 %v185_v47, %v184_v46  ;;  %v631_v51 = vpack.c.bf16 %v262_v49, %v261_v48  ;;  %v263_v52 = vld [vmem:[#allocation8 + $0x10] sm:$0xff]  ;;  %v264_v53 = vld [vmem:[#allocation8 + $0x18] sm:$0xff]  ;;  %v265_v56 = vld [vmem:[#allocation8 + $0x20] sm:$0xff] }
  0x57   :  { %576 = vmatprep.subr.bf16.mxu0 %v575_v15  ;;  %v78_v54 = vld [vmem:[#allocation2 + $0x8] sm:$0xff]  ;;  %v635_v55 = vpack.c.bf16 %v264_v53, %v263_v52  ;;  %v266_v57 = vld [vmem:[#allocation8 + $0x28] sm:$0xff]  ;;  %v267_v59 = vld [vmem:[#allocation8 + $0x30] sm:$0xff] }
  0x58   :  { %606 = vmatpush3.bf16.xpose.msra.mxu1 %v603_v14  ;;  %v639_v58 = vpack.c.bf16 %v266_v57, %v265_v56  ;;  %v268_v60 = vld [vmem:[#allocation8 + $0x38] sm:$0xff]  ;;  %v269_v62 = vld [vmem:[#allocation8 + $0x40] sm:$0xff]  ;;  %v270_v63 = vld [vmem:[#allocation8 + $0x48] sm:$0xff] }
  0x59   :  { %608 = vmatprep.subr.bf16.mxu1 %v607_v20  ;;  %v643_v61 = vpack.c.bf16 %v268_v60, %v267_v59  ;;  %v647_v0 = vpack.c.bf16 %v270_v63, %v269_v62  ;;  %v271_v1 = vld [vmem:[#allocation8 + $0x50] sm:$0xff]  ;;  %v272_v2 = vld [vmem:[#allocation8 + $0x58] sm:$0xff]  ;;  %v273_v4 = vld [vmem:[#allocation8 + $0x60] sm:$0xff] }
  0x5a   :  { %v651_v3 = vpack.c.bf16 %v272_v2, %v271_v1  ;;  %v274_v5 = vld [vmem:[#allocation8 + $0x68] sm:$0xff]  ;;  %v275_v7 = vld [vmem:[#allocation8 + $0x70] sm:$0xff]  ;;  %v276_v8 = vld [vmem:[#allocation8 + $0x78] sm:$0xff] }
  0x5b   :  { %v655_v6 = vpack.c.bf16 %v274_v5, %v273_v4  ;;  %v659_v9 = vpack.c.bf16 %v276_v8, %v275_v7 }
  0x5e   :  { %578 = vmatpush3.bf16.xpose.msra.mxu0 %v575_v15 }
  0x5f   :  { %580 = vmatprep.subr.bf16.mxu0 %v579_v21 }
  0x60   :  { %610 = vmatpush3.bf16.xpose.msra.mxu1 %v607_v20 }
  0x61   :  { %612 = vmatprep.subr.bf16.mxu1 %v611_v26 }
  0x66   :  { %582 = vmatpush3.bf16.xpose.msra.mxu0 %v579_v21 }
  0x67   :  { %584 = vmatprep.subr.bf16.mxu0 %v583_v27 }
  0x68   :  { %614 = vmatpush3.bf16.xpose.msra.mxu1 %v611_v26 }
  0x69   :  { %616 = vmatprep.subr.bf16.mxu1 %v615_v32 }
  0x6e   :  { %586 = vmatpush3.bf16.xpose.msra.mxu0 %v583_v27 }
  0x6f   :  { %588 = vmatprep.subr.bf16.mxu0 %v587_v33 }
  0x70   :  { %618 = vmatpush3.bf16.xpose.msra.mxu1 %v615_v32 }
  0x71   :  { %620 = vmatprep.subr.bf16.mxu1 %v619_v38 }
  0x76   :  { %590 = vmatpush3.bf16.xpose.msra.mxu0 %v587_v33 }
  0x77   :  { %592 = vmatprep.subr.bf16.mxu0 %v591_v39 }
  0x78   :  { %622 = vmatpush3.bf16.xpose.msra.mxu1 %v619_v38 }
  0x79   :  { %624 = vmatprep.subr.bf16.mxu1 %v623_v44 }
  0x7e   :  { %594 = vmatpush3.bf16.xpose.msra.mxu0 %v591_v39 }
  0x7f   :  { %596 = vmatprep.subr.bf16.mxu0 %v595_v45 }
  0x80   :  { %626 = vmatpush3.bf16.xpose.msra.mxu1 %v623_v44 }
  0x81   :  { %628 = vmatprep.subr.bf16.mxu1 %v627_v50 }
  0x86   :  { %598 = vmatpush3.bf16.xpose.msra.mxu0 %v595_v45 }
  0x87   :  { %632 = vmatprep.subr.bf16.mxu0 %v631_v51 }
  0x88   :  { %630 = vmatpush3.bf16.xpose.msra.mxu1 %v627_v50 }
  0x8d   :  { %495 = vmatmul.mubr.f32.vlgmr.msra.gmra.mrb[0].mxu0 %v78_v54 }
  0x8e   :  { %634 = vmatpush3.bf16.xpose.msra.mxu0 %v631_v51  ;;  %564 = vmatprep.mubr.f32.mxu0 %v954_v11 }
  0x8f   :  { %636 = vmatprep.subr.bf16.mxu0 %v635_v55  ;;  %530 = vmatmul.mubr.f32.vlgmr.msra.gmra.mrb[0].mxu1 %v78_v54 }
  0x96   :  { %638 = vmatpush3.bf16.xpose.msra.mxu0 %v635_v55 }
  0x97   :  { %640 = vmatprep.subr.bf16.mxu0 %v639_v58 }
  0x9e   :  { %642 = vmatpush3.bf16.xpose.msra.mxu0 %v639_v58 }
  0x9f   :  { %644 = vmatprep.subr.bf16.mxu0 %v643_v61 }
  0xa6   :  { %646 = vmatpush3.bf16.xpose.msra.mxu0 %v643_v61 }
  0xa7   :  { %648 = vmatprep.subr.bf16.mxu0 %v647_v0 }
  0xae   :  { %650 = vmatpush3.bf16.xpose.msra.mxu0 %v647_v0 }
  0xaf   :  { %652 = vmatprep.subr.bf16.mxu0 %v651_v3 }
  0xb6   :  { %654 = vmatpush3.bf16.xpose.msra.mxu0 %v651_v3 }
  0xb7   :  { %656 = vmatprep.subr.bf16.mxu0 %v655_v6 }
  0xbe   :  { %658 = vmatpush3.bf16.xpose.msra.mxu0 %v655_v6 }
  0xbf   :  { %660 = vmatprep.subr.bf16.mxu0 %v659_v9 }
  0xc6   :  { %662 = vmatpush3.bf16.xpose.msra.mxu0 %v659_v9 }
  0xcd   :  { %565 = vmatmul.mubr.f32.vlgmr.msra.gmra.mrb[2].mxu0 %v78_v54 }
 0x160   :  { %v496_v10 = vpop.f32.mrb[0].mxu0 }
 0x161   :  { %353 = vst [vmem:[#allocation10 + $0x8] sm:$0xff] %v496_v10  ;;  %v161_v11 = vpop.f32.mrb[1].mxu0 }
 0x162   :  { %352 = vst [vmem:[#allocation10] sm:$0xff] %v161_v11 }
 0x163   :  { %771 = shalt.err (!%p768_p8)
}
 0x164   :  { %s772_s28 = scalar_lea.hbm %s1008_s4, 256 }
 0x165   :  { %p773_p9 = scmp.ne.s32.totalorder %s1008_s4, %s772_s28  ;;  %p776_p10 = scmp.lt.u32.totalorder %s772_s28, %s1008_s4 }
 0x167   :  { %p778_p11 = pnand %p776_p10, %p773_p9 }
 0x169   :  { %781 = shalt.err (!%p778_p11)
}
 0x16a   :  { %369 = dma.vmem_to_hbm [thread:$0]  %s364_s21, 256, %s1008_s4, [#allocation4], %s838_s9, %s838_s9, %s839_s10   ;;  %v531_v12 = vpop.f32.mrb[0].mxu1 }
 0x16b   :  { %355 = vst [vmem:[#allocation11 + $0x8] sm:$0xff] %v531_v12  ;;  %v252_v13 = vpop.f32.mrb[1].mxu1  ;;  %s782_s24 = scalar_lea.vmem %s376_s23, 256  ;;  %p787_p13 = scmp.lt.s32.totalorder %s376_s23, %s376_s23 }
 0x16c   :  { %354 = vst [vmem:[#allocation11] sm:$0xff] %v252_v13  ;;  %p783_p12 = scmp.ne.s32.totalorder %s376_s23, %s782_s24  ;;  %p788_p0 = scmp.lt.s32.totalorder %s782_s24, %s782_s24 }
 0x16e   :  { %p789_p1 = por %p788_p0, %p787_p13 }
 0x170   :  { %p790_p2 = pnand %p789_p1, %p783_p12 }
 0x172   :  { %793 = shalt.err (!%p790_p2)
}
 0x173   :  { %s794_s14 = scalar_lea.hbm %s1009_s5, 256 }
 0x174   :  { %p795_p3 = scmp.ne.s32.totalorder %s1009_s5, %s794_s14  ;;  %p798_p4 = scmp.lt.u32.totalorder %s794_s14, %s1009_s5 }
 0x176   :  { %p800_p5 = pnand %p798_p4, %p795_p3 }
 0x178   :  { %803 = shalt.err (!%p800_p5)
}
 0x179   :  { %381 = dma.vmem_to_hbm [thread:$0]  %s376_s23, 256, %s1009_s5, [#allocation12], %s838_s9, %s838_s9, %s839_s10  }
 0x17a   :  { %s844_s20 = smov [#allocation13]  }
 0x17b   :  { %s387_s2 = sshll.u32 %s844_s20, 4  ;;  %s388_s2 = int_to_ptr.vmem [resolvable:$true] %s387_s2 }
 0x17c   :  { %s804_s1 = scalar_lea.vmem %s388_s2, 256  ;;  %p809_p7 = scmp.lt.s32.totalorder %s388_s2, %s388_s2 }
 0x17d   :  { %p805_p6 = scmp.ne.s32.totalorder %s388_s2, %s804_s1  ;;  %p810_p8 = scmp.lt.s32.totalorder %s804_s1, %s804_s1 }
 0x17f   :  { %p811_p9 = por %p810_p8, %p809_p7 }
 0x181   :  { %p812_p10 = pnand %p811_p9, %p805_p6 }
 0x1a0   :  { %v566_v14 = vpop.f32.mrb[2].mxu0 }
 0x1a1   :  { %357 = vst [vmem:[#allocation13 + $0x8] sm:$0xff] %v566_v14  ;;  %v343_v15 = vpop.f32.mrb[3].mxu0 }
 0x1a2   :  { %356 = vst [vmem:[#allocation13] sm:$0xff] %v343_v15 }
 0x1a3   :  { %815 = shalt.err (!%p812_p10)
}
 0x1a4   :  { %s816_s22 = scalar_lea.hbm %s1010_s6, 256 }
 0x1a5   :  { %p817_p11 = scmp.ne.s32.totalorder %s1010_s6, %s816_s22  ;;  %p820_p12 = scmp.lt.u32.totalorder %s816_s22, %s1010_s6 }
 0x1a7   :  { %p822_p13 = pnand %p820_p12, %p817_p11 }
 0x1a9   :  { %825 = shalt.err (!%p822_p13)
}
 0x1aa   :  { %393 = dma.vmem_to_hbm [thread:$0]  %s388_s2, 256, %s1010_s6, [#allocation12], %s838_s9, %s838_s9, %s839_s10  }
 0x1ab   :  { %832 = dma.done.wait [#allocation4], 256  }
 0x1ac   :  { %833 = vsyncadd [#allocation4], 4294967040 }
 0x1ad   :  { %834 = dma.done.wait [#allocation12], 512  }
 0x1ae   :  { %835 = vsyncadd [#allocation12], 4294966784 }
 0x1af   :  { %403 = vsyncpa [#allocation3], 1 }
 0x1b0   :  { %404 = vsyncpa [#allocation6], 1 }
 0x1b1   :  { %405 = vsyncpa [#allocation9], 1 }
 0x1b2   :  { %406 = vsyncpa [#allocation4], 1 }
 0x1b3   :  { %407 = vsyncpa [#allocation12], 1 }

</bundles_post_ra>
